<compile_context>
chip_gen: v7x
topology: tpu7x:2x2x1
jax: 0.10.0
libtpu: 0.0.40
codegen_flags: <defaults>
</compile_context>

<pallas_src>
import functools
import math

import jax
import jax.numpy as jnp
from jax import lax
from jax.experimental import pallas as pl
from jax.experimental.pallas import tpu as pltpu


def _round_up(x, m):
    return (x + m - 1) // m * m


def _embedder_kernel(ids_ref, node_hbm, pos_ref, mask_ref, gamma_ref, beta_ref,
                     out_ref, gbuf, gsem, *, tq, d_actual):
    """One grid step = one (tq, Dp) tile of tokens.

    ids_ref   : (BL_pad,) int32  SMEM (scalar prefetch) — gather indices
    node_hbm  : (V, Dp)   f32    HBM (memory_space=pl.ANY)
    pos_ref   : (L, Dp)   f32    VMEM, resident (constant block index)
    mask_ref  : (tq, 1)   f32    VMEM, 0/1 padding-mask column for this tile
    gamma_ref : (1, Dp)   f32    VMEM (resident)
    beta_ref  : (1, Dp)   f32    VMEM (resident)
    out_ref   : (tq, Dp)  f32    VMEM output tile
    gbuf      : (2, tq, Dp) f32  VMEM scratch — double-buffered gathered rows
    gsem      : DMA semaphores, shape (2,) — one per gather slot
    """
    t = pl.program_id(0)
    n_tiles = pl.num_programs(0)
    cur = t & 1

    def issue_gather(tile_idx, slot):
        base = tile_idx * tq

        def body(r, carry):
            tok = ids_ref[base + r]
            pltpu.make_async_copy(node_hbm.at[tok], gbuf.at[slot, r],
                                  gsem.at[slot]).start()
            return carry

        lax.fori_loop(0, tq, body, 0)

    # Prologue: first tile's rows have not been prefetched yet.
    @pl.when(t == 0)
    def _():
        issue_gather(0, 0)

    # Prefetch the NEXT tile's rows into the other slot so those DMAs overlap
    # this tile's wait + compute (manual cross-step double buffering, P4).
    @pl.when(t + 1 < n_tiles)
    def _():
        issue_gather(t + 1, 1 - cur)

    # Wait for the tq row copies belonging to the current tile.
    def wait_body(r, carry):
        pltpu.make_async_copy(node_hbm.at[0], gbuf.at[cur, r],
                              gsem.at[cur]).wait()
        return carry

    lax.fori_loop(0, tq, wait_body, 0)

    # Positional rows: tile starts are multiples of L (tq % L == 0), so the
    # positional pattern inside a tile is the whole (L, Dp) table repeated.
    pos = pos_ref[...]
    reps = tq // pos.shape[0]
    pos_tile = pos if reps == 1 else jnp.concatenate([pos] * reps, axis=0)

    # Fused (node + pos) * mask — one broadcast VPU multiply over the tile.
    x = (gbuf[cur] + pos_tile) * mask_ref[...]

    # LayerNorm over the real hidden dim.  Padded lanes are exactly zero, so
    # they do not perturb the sums; padded gamma/beta zero them in the output.
    inv_d = 1.0 / d_actual
    s1 = jnp.sum(x, axis=-1, keepdims=True)
    s2 = jnp.sum(x * x, axis=-1, keepdims=True)
    mean = s1 * inv_d
    var = jnp.maximum(s2 * inv_d - mean * mean, 0.0)
    inv_std = lax.rsqrt(var + 1e-5)
    out_ref[...] = (x - mean) * inv_std * gamma_ref[...] + beta_ref[...]
    # Dropout is identity at inference.
    # TODO(synk): training-mode dropout (p=0.2) would use pltpu.prng_* here.


def embedder_forward(items, node_table, pos_table, gamma, beta, *,
                     tq_target=256):
    """items: (B, L) int32. Returns (embeddings (B, L, D) f32, mask (B, L) bool)."""
    B, L = items.shape
    V, D = node_table.shape
    assert pos_table.shape == (L, D), "positional table must match sequence length"

    BL = B * L
    Dp = _round_up(D, 128)                       # lane-dense blocks & stores

    # Tile size: multiple of lcm(8, L) (sublane rule + positional alignment),
    # near tq_target but never larger than the padded token count.
    unit = 8 * L // math.gcd(8, L)
    tq = min(_round_up(tq_target, unit), _round_up(BL, unit))
    BL_pad = _round_up(BL, tq)
    n_tiles = BL_pad // tq

    ids_flat = items.reshape(BL).astype(jnp.int32)
    ids_pad = jnp.pad(ids_flat, (0, BL_pad - BL))        # padded rows -> id 0
    ids_gather = jnp.clip(ids_pad, 0, V - 1)             # never OOB-DMA
    mask_col = (ids_pad != 0).astype(jnp.float32).reshape(BL_pad, 1)

    def pad_d(a):
        return jnp.pad(a.astype(jnp.float32), ((0, 0), (0, Dp - D)))

    node_p = pad_d(node_table)
    pos_p = pad_d(pos_table)
    gamma_p = pad_d(gamma.reshape(1, D))
    beta_p = pad_d(beta.reshape(1, D))

    grid_spec = pltpu.PrefetchScalarGridSpec(
        num_scalar_prefetch=1,
        grid=(n_tiles,),
        in_specs=[
            pl.BlockSpec(memory_space=pl.ANY),                # node table, HBM
            pl.BlockSpec((L, Dp), lambda t, ids: (0, 0)),     # pos table resident
            pl.BlockSpec((tq, 1), lambda t, ids: (t, 0)),     # mask column tile
            pl.BlockSpec((1, Dp), lambda t, ids: (0, 0)),     # gamma (resident)
            pl.BlockSpec((1, Dp), lambda t, ids: (0, 0)),     # beta  (resident)
        ],
        out_specs=pl.BlockSpec((tq, Dp), lambda t, ids: (t, 0)),
        scratch_shapes=[
            pltpu.VMEM((2, tq, Dp), jnp.float32),
            pltpu.SemaphoreType.DMA((2,)),
        ],
    )

    kernel = functools.partial(_embedder_kernel, tq=tq, d_actual=D)
    emb_full = pl.pallas_call(
        kernel,
        out_shape=jax.ShapeDtypeStruct((BL_pad, Dp), jnp.float32),
        grid_spec=grid_spec,
        compiler_params=pltpu.CompilerParams(
            # The cross-step gather prefetch carries state between grid steps,
            # so this axis must stay sequential (not "parallel"/megacore).
            dimension_semantics=("arbitrary",),
        ),
    )(ids_gather, node_p, pos_p, mask_col, gamma_p, beta_p)

    # Mask is a trivial comparison; keep it out of the kernel so we never emit
    # a lane-width-1 kernel output.
    mask = items != 0
    emb = emb_full[:BL, :D].reshape(B, L, D)
    return emb, mask


if __name__ == "__main__":
    # Small, deterministic configuration consistent with the module:
    #   n_entities=10 -> vocab = n_entities + 2 = 12, dim=32, max_length=8,
    #   use_position=True, batch=2, sequence length = max_length.
    n_entities = 10
    dim = 32
    max_length = 8
    batch = 2
    vocab = n_entities + 2

    key = jax.random.PRNGKey(0)
    k_node, k_pos, k_items = jax.random.split(key, 3)

    # nn.Embedding default init ~ N(0, 1); padding_idx=0 row zeroed.
    node_table = jax.random.normal(k_node, (vocab, dim), dtype=jnp.float32)
    node_table = node_table.at[0].set(0.0)
    pos_table = jax.random.normal(k_pos, (max_length, dim), dtype=jnp.float32)
    # nn.LayerNorm default init: weight = 1, bias = 0.
    gamma = jnp.ones((dim,), dtype=jnp.float32)
    beta = jnp.zeros((dim,), dtype=jnp.float32)

    # Item ids in [0, vocab); include some padding (0) positions.
    items = jax.random.randint(k_items, (batch, max_length), 0, vocab,
                               dtype=jnp.int32)
    items = items.at[0, -2:].set(0)
    items = items.at[1, -1:].set(0)

    embeddings, mask = embedder_forward(items, node_table, pos_table, gamma, beta)
    jax.block_until_ready((embeddings, mask))

    # Lightweight sanity check against a pure-JAX reference.
    emb_ref = node_table[items] * mask[..., None]
    emb_ref = emb_ref + pos_table[None, :, :] * mask[..., None]
    mean = emb_ref.mean(-1, keepdims=True)
    var = ((emb_ref - mean) ** 2).mean(-1, keepdims=True)
    emb_ref = (emb_ref - mean) / jnp.sqrt(var + 1e-5) * gamma + beta
    assert jnp.allclose(embeddings, emb_ref, atol=1e-4, rtol=1e-4)
    assert jnp.array_equal(mask, items != 0)

    print("KERNEL_OK")
</pallas_src>

<mosaic_0001>
module attributes {stable_mosaic.version = 11 : i64} {
  func.func @_embedder_kernel(%arg0: i32, %arg1: memref<16xi32, #tpu.memory_space<smem>>, %arg2: memref<12x128xf32, #tpu.memory_space<any>>, %arg3: memref<8x128xf32, #tpu.memory_space<vmem>>, %arg4: memref<16x1xf32, #tpu.memory_space<vmem>>, %arg5: memref<1x128xf32, #tpu.memory_space<vmem>>, %arg6: memref<1x128xf32, #tpu.memory_space<vmem>>, %arg7: memref<16x128xf32, #tpu.memory_space<vmem>>, %arg8: memref<2x16x128xf32, #tpu.memory_space<vmem>>, %arg9: memref<2x!tpu.dma_semaphore, #tpu.memory_space<semaphore_mem>>) attributes {dimension_semantics = [#tpu.dimension_semantics<arbitrary>], iteration_bounds = array<i64: 1>, scalar_prefetch = 1 : i64, scratch_operands = 2 : i64, tpu.core_type = #tpu.core_type<tc>, window_params = [{}, {pipeline_mode = #tpu.pipeline_mode<synchronous>, transform_indices = @transform_1, window_bounds = array<i64: 8, 128>}, {transform_indices = @transform_2, window_bounds = array<i64: 16, 1>}, {pipeline_mode = #tpu.pipeline_mode<synchronous>, transform_indices = @transform_3, window_bounds = array<i64: 1, 128>}, {pipeline_mode = #tpu.pipeline_mode<synchronous>, transform_indices = @transform_4, window_bounds = array<i64: 1, 128>}, {transform_indices = @transform_5, window_bounds = array<i64: 16, 128>}]} {
    %c1_i32 = arith.constant 1 : i32
    %0 = arith.andi %arg0, %c1_i32 : i32
    %c0_i32 = arith.constant 0 : i32
    %1 = arith.cmpi eq, %arg0, %c0_i32 : i32
    %2 = arith.extui %1 : i1 to i32
    %c0_i32_0 = arith.constant 0 : i32
    %3 = arith.cmpi ne, %2, %c0_i32_0 : i32
    scf.if %3 {
      %c0_i32_23 = arith.constant 0 : i32
      %c16_i32_24 = arith.constant 16 : i32
      %45 = arith.addi %c0_i32_23, %c16_i32_24 : i32
      %c1_i32_25 = arith.constant 1 : i32
      scf.for %arg10 = %c0_i32_23 to %45 step %c1_i32_25  : i32 {
        %c0_i32_27 = arith.constant 0 : i32
        %46 = arith.addi %c0_i32_27, %arg10 : i32
        %47 = arith.index_cast %46 : i32 to index
        %48 = memref.load %arg1[%47] : memref<16xi32, #tpu.memory_space<smem>>
        %c0_i32_28 = arith.constant 0 : i32
        %c0_i32_29 = arith.constant 0 : i32
        %c0_i32_30 = arith.constant 0 : i32
        %49 = tpu.memref_slice %arg2[%48, %c0_i32_30] : memref<12x128xf32, #tpu.memory_space<any>> -> memref<1x128xf32, #tpu.memory_space<any>>
        %50 = tpu.memref_squeeze %49 : memref<1x128xf32, #tpu.memory_space<any>> -> memref<128xf32, #tpu.memory_space<any>>
        %c0_i32_31 = arith.constant 0 : i32
        %51 = tpu.memref_slice %arg8[%c0_i32_28, %arg10, %c0_i32_31] : memref<2x16x128xf32, #tpu.memory_space<vmem>> -> memref<1x1x128xf32, #tpu.memory_space<vmem>>
        %52 = tpu.memref_squeeze %51 : memref<1x1x128xf32, #tpu.memory_space<vmem>> -> memref<128xf32, #tpu.memory_space<vmem>>
        %53 = tpu.memref_slice %arg9[%c0_i32_29] : memref<2x!tpu.dma_semaphore, #tpu.memory_space<semaphore_mem>> -> memref<1x!tpu.dma_semaphore, #tpu.memory_space<semaphore_mem>>
        %54 = tpu.memref_squeeze %53 : memref<1x!tpu.dma_semaphore, #tpu.memory_space<semaphore_mem>> -> memref<!tpu.dma_semaphore, #tpu.memory_space<semaphore_mem>>
        tpu.enqueue_dma source(%50 : memref<128xf32, #tpu.memory_space<any>>) target(%52 : memref<128xf32, #tpu.memory_space<vmem>>) target_semaphore(%54 : memref<!tpu.dma_semaphore, #tpu.memory_space<semaphore_mem>>)
      }
      %c16_i32_26 = arith.constant 16 : i32
    } else {
    }
    %c1_i32_1 = arith.constant 1 : i32
    %4 = arith.addi %arg0, %c1_i32_1 : i32
    %c1_i32_2 = arith.constant 1 : i32
    %5 = arith.cmpi slt, %4, %c1_i32_2 : i32
    %6 = arith.extui %5 : i1 to i32
    %c0_i32_3 = arith.constant 0 : i32
    %7 = arith.cmpi ne, %6, %c0_i32_3 : i32
    scf.if %7 {
      %c1_i32_23 = arith.constant 1 : i32
      %45 = arith.addi %arg0, %c1_i32_23 : i32
      %c1_i32_24 = arith.constant 1 : i32
      %46 = arith.subi %c1_i32_24, %0 : i32
      %c16_i32_25 = arith.constant 16 : i32
      %47 = arith.muli %45, %c16_i32_25 : i32
      %c0_i32_26 = arith.constant 0 : i32
      %c16_i32_27 = arith.constant 16 : i32
      %48 = arith.addi %c0_i32_26, %c16_i32_27 : i32
      %c1_i32_28 = arith.constant 1 : i32
      scf.for %arg10 = %c0_i32_26 to %48 step %c1_i32_28  : i32 {
        %49 = arith.addi %47, %arg10 : i32
        %50 = arith.index_cast %49 : i32 to index
        %51 = memref.load %arg1[%50] : memref<16xi32, #tpu.memory_space<smem>>
        %c0_i32_30 = arith.constant 0 : i32
        %52 = tpu.memref_slice %arg2[%51, %c0_i32_30] : memref<12x128xf32, #tpu.memory_space<any>> -> memref<1x128xf32, #tpu.memory_space<any>>
        %53 = tpu.memref_squeeze %52 : memref<1x128xf32, #tpu.memory_space<any>> -> memref<128xf32, #tpu.memory_space<any>>
        %c0_i32_31 = arith.constant 0 : i32
        %54 = tpu.memref_slice %arg8[%46, %arg10, %c0_i32_31] : memref<2x16x128xf32, #tpu.memory_space<vmem>> -> memref<1x1x128xf32, #tpu.memory_space<vmem>>
        %55 = tpu.memref_squeeze %54 : memref<1x1x128xf32, #tpu.memory_space<vmem>> -> memref<128xf32, #tpu.memory_space<vmem>>
        %56 = tpu.memref_slice %arg9[%46] : memref<2x!tpu.dma_semaphore, #tpu.memory_space<semaphore_mem>> -> memref<1x!tpu.dma_semaphore, #tpu.memory_space<semaphore_mem>>
        %57 = tpu.memref_squeeze %56 : memref<1x!tpu.dma_semaphore, #tpu.memory_space<semaphore_mem>> -> memref<!tpu.dma_semaphore, #tpu.memory_space<semaphore_mem>>
        tpu.enqueue_dma source(%53 : memref<128xf32, #tpu.memory_space<any>>) target(%55 : memref<128xf32, #tpu.memory_space<vmem>>) target_semaphore(%57 : memref<!tpu.dma_semaphore, #tpu.memory_space<semaphore_mem>>)
      }
      %c16_i32_29 = arith.constant 16 : i32
    } else {
    }
    %c0_i32_4 = arith.constant 0 : i32
    %c16_i32 = arith.constant 16 : i32
    %8 = arith.addi %c0_i32_4, %c16_i32 : i32
    %c1_i32_5 = arith.constant 1 : i32
    scf.for %arg10 = %c0_i32_4 to %8 step %c1_i32_5  : i32 {
      %c0_i32_23 = arith.constant 0 : i32
      %c0_i32_24 = arith.constant 0 : i32
      %45 = tpu.memref_slice %arg2[%c0_i32_23, %c0_i32_24] : memref<12x128xf32, #tpu.memory_space<any>> -> memref<1x128xf32, #tpu.memory_space<any>>
      %46 = tpu.memref_squeeze %45 : memref<1x128xf32, #tpu.memory_space<any>> -> memref<128xf32, #tpu.memory_space<any>>
      %c0_i32_25 = arith.constant 0 : i32
      %47 = tpu.memref_slice %arg8[%0, %arg10, %c0_i32_25] : memref<2x16x128xf32, #tpu.memory_space<vmem>> -> memref<1x1x128xf32, #tpu.memory_space<vmem>>
      %48 = tpu.memref_squeeze %47 : memref<1x1x128xf32, #tpu.memory_space<vmem>> -> memref<128xf32, #tpu.memory_space<vmem>>
      %49 = tpu.memref_slice %arg9[%0] : memref<2x!tpu.dma_semaphore, #tpu.memory_space<semaphore_mem>> -> memref<1x!tpu.dma_semaphore, #tpu.memory_space<semaphore_mem>>
      %50 = tpu.memref_squeeze %49 : memref<1x!tpu.dma_semaphore, #tpu.memory_space<semaphore_mem>> -> memref<!tpu.dma_semaphore, #tpu.memory_space<semaphore_mem>>
      tpu.wait_dma2 semaphore(%50 : memref<!tpu.dma_semaphore, #tpu.memory_space<semaphore_mem>>) src(%46 : memref<128xf32, #tpu.memory_space<any>>) dst(%48 : memref<128xf32, #tpu.memory_space<vmem>>)
    }
    %c16_i32_6 = arith.constant 16 : i32
    %c0 = arith.constant 0 : index
    %c0_7 = arith.constant 0 : index
    %9 = vector.load %arg3[%c0, %c0_7] : memref<8x128xf32, #tpu.memory_space<vmem>>, vector<8x128xf32>
    %10 = tpu.concatenate %9, %9 in 0 : vector<8x128xf32>, vector<8x128xf32> -> vector<16x128xf32>
    %11 = arith.index_cast %0 : i32 to index
    %c0_8 = arith.constant 0 : index
    %c0_9 = arith.constant 0 : index
    %12 = vector.load %arg8[%11, %c0_8, %c0_9] : memref<2x16x128xf32, #tpu.memory_space<vmem>>, vector<1x16x128xf32>
    %13 = vector.shape_cast %12 : vector<1x16x128xf32> to vector<16x128xf32>
    %14 = arith.addf %13, %10 : vector<16x128xf32>
    %c0_10 = arith.constant 0 : index
    %c0_11 = arith.constant 0 : index
    %15 = vector.load %arg4[%c0_10, %c0_11] : memref<16x1xf32, #tpu.memory_space<vmem>>, vector<16x1xf32>
    %16 = vector.broadcast %15 : vector<16x1xf32> to vector<16x128xf32>
    %17 = arith.mulf %14, %16 : vector<16x128xf32>
    %cst = arith.constant dense<0.000000e+00> : vector<16xf32>
    %18 = vector.multi_reduction <add>, %17, %cst [1] : vector<16x128xf32> to vector<16xf32>
    %19 = vector.shape_cast %18 : vector<16xf32> to vector<16x1xf32>
    %20 = arith.mulf %17, %17 : vector<16x128xf32>
    %cst_12 = arith.constant dense<0.000000e+00> : vector<16xf32>
    %21 = vector.multi_reduction <add>, %20, %cst_12 [1] : vector<16x128xf32> to vector<16xf32>
    %22 = vector.shape_cast %21 : vector<16xf32> to vector<16x1xf32>
    %cst_13 = arith.constant 3.125000e-02 : f32
    %23 = vector.broadcast %cst_13 : f32 to vector<16x1xf32>
    %24 = arith.mulf %19, %23 : vector<16x1xf32>
    %cst_14 = arith.constant 3.125000e-02 : f32
    %25 = vector.broadcast %cst_14 : f32 to vector<16x1xf32>
    %26 = arith.mulf %22, %25 : vector<16x1xf32>
    %27 = arith.mulf %24, %24 : vector<16x1xf32>
    %28 = arith.subf %26, %27 : vector<16x1xf32>
    %cst_15 = arith.constant 0.000000e+00 : f32
    %29 = vector.broadcast %cst_15 : f32 to vector<16x1xf32>
    %30 = arith.maximumf %28, %29 : vector<16x1xf32>
    %cst_16 = arith.constant 9.99999974E-6 : f32
    %31 = vector.broadcast %cst_16 : f32 to vector<16x1xf32>
    %32 = arith.addf %30, %31 : vector<16x1xf32>
    %33 = math.rsqrt %32 : vector<16x1xf32>
    %34 = vector.broadcast %24 : vector<16x1xf32> to vector<16x128xf32>
    %35 = arith.subf %17, %34 : vector<16x128xf32>
    %36 = vector.broadcast %33 : vector<16x1xf32> to vector<16x128xf32>
    %37 = arith.mulf %35, %36 : vector<16x128xf32>
    %c0_17 = arith.constant 0 : index
    %c0_18 = arith.constant 0 : index
    %38 = vector.load %arg5[%c0_17, %c0_18] : memref<1x128xf32, #tpu.memory_space<vmem>>, vector<1x128xf32>
    %39 = vector.broadcast %38 : vector<1x128xf32> to vector<16x128xf32>
    %40 = arith.mulf %37, %39 : vector<16x128xf32>
    %c0_19 = arith.constant 0 : index
    %c0_20 = arith.constant 0 : index
    %41 = vector.load %arg6[%c0_19, %c0_20] : memref<1x128xf32, #tpu.memory_space<vmem>>, vector<1x128xf32>
    %42 = vector.broadcast %41 : vector<1x128xf32> to vector<16x128xf32>
    %43 = arith.addf %40, %42 : vector<16x128xf32>
    %c0_21 = arith.constant 0 : index
    %c0_22 = arith.constant 0 : index
    %44 = vector.load %arg7[%c0_21, %c0_22] : memref<16x128xf32, #tpu.memory_space<vmem>>, vector<16x128xf32>
    tpu.vector_store %arg7[%c0_21, %c0_22], %43 {strides = array<i32>} : memref<16x128xf32, #tpu.memory_space<vmem>>, vector<16x128xf32>,
    return
  }
  func.func @transform_1(%arg0: i32, %arg1: memref<16xi32, #tpu.memory_space<smem>>) -> (i32, i32) {
    %c0_i32 = arith.constant 0 : i32
    %c0_i32_0 = arith.constant 0 : i32
    %c0_i32_1 = arith.constant 0 : i32
    return %c0_i32, %c0_i32_0 : i32, i32
  }
  func.func @transform_2(%arg0: i32, %arg1: memref<16xi32, #tpu.memory_space<smem>>) -> (i32, i32) {
    %c0_i32 = arith.constant 0 : i32
    %c0_i32_0 = arith.constant 0 : i32
    return %arg0, %c0_i32 : i32, i32
  }
  func.func @transform_3(%arg0: i32, %arg1: memref<16xi32, #tpu.memory_space<smem>>) -> (i32, i32) {
    %c0_i32 = arith.constant 0 : i32
    %c0_i32_0 = arith.constant 0 : i32
    %c0_i32_1 = arith.constant 0 : i32
    return %c0_i32, %c0_i32_0 : i32, i32
  }
  func.func @transform_4(%arg0: i32, %arg1: memref<16xi32, #tpu.memory_space<smem>>) -> (i32, i32) {
    %c0_i32 = arith.constant 0 : i32
    %c0_i32_0 = arith.constant 0 : i32
    %c0_i32_1 = arith.constant 0 : i32
    return %c0_i32, %c0_i32_0 : i32, i32
  }
  func.func @transform_5(%arg0: i32, %arg1: memref<16xi32, #tpu.memory_space<smem>>) -> (i32, i32) {
    %c0_i32 = arith.constant 0 : i32
    %c0_i32_0 = arith.constant 0 : i32
    return %arg0, %c0_i32 : i32, i32
  }
}

</mosaic_0001>

<bundles_post_ra>
// kernel: tpu_custom_call.1
= control target key start
LH: loop header
LB: loop body
LE: loop exit
PB: predicated region body
PF: predicated region fallthrough
CT: control target
= control target key end

     0   :  { %s469_s0 = inlined_call_operand.hbm [shape: s32[16], index: 0, kind: input, shape index: {}]   ;;  %s470_s1 = inlined_call_operand.vmem [shape: f32[12,128], index: 1, kind: input, shape index: {}]   ;;  %s471_s2 = inlined_call_operand.vmem [shape: f32[8,128], index: 2, kind: input, shape index: {}]   ;;  %s472_s3 = inlined_call_operand.vmem [shape: f32[16,1], index: 3, kind: input, shape index: {}]   ;;  %s473_s4 = inlined_call_operand.vmem [shape: f32[1,128], index: 4, kind: input, shape index: {}]   ;;  %s474_s5 = inlined_call_operand.vmem [shape: f32[1,128], index: 5, kind: input, shape index: {}]   ;;  %s475_s6 = inlined_call_operand.hbm [shape: f32[16,128], index: 6, kind: output, shape index: {}]  }
   0x1   :  { %s333_s23 = scalar_lea.hbm %s469_s0, 16 }
   0x2   :  { %p334_p0 = scmp.ne.s32.totalorder %s469_s0, %s333_s23  ;;  %p337_p1 = scmp.lt.u32.totalorder %s333_s23, %s469_s0 }
   0x4   :  { %p339_p2 = pnand %p337_p1, %p334_p0 }
   0x6   :  { %342 = shalt.err (!%p339_p2)  }
   0x7   :  { %s387_s28 = smov [#allocation5]  }
   0x8   :  { %12 = dma.hbm_to_smem %s469_s0, 16, %s387_s28, [#allocation4] }
   0x9   :  { %373 = dma.done.wait [#allocation4], 16 }
   0xa   :  { %374 = vsyncadd [#allocation4], 4294967280 }
   0xb   :  { %14 = sfence }
   0xc   :  { %15 = vsyncpa [#allocation7], 0  ;;  %s379_s7 = smov 0  }
   0xd LB: > { %s35_s8 = sld [smem:[#allocation5 + %s381_s7]]  ;;  %s37_s12 = scalar_lea.vmem [#allocation2], %s381_s7  ;;  %s381_s7 = sphi %s379_s7, %s34_s7  }
  0x13   : > { %s36_s11 = scalar_lea.vmem %s470_s1, %s35_s8 }
  0x14   : > { %v55_v0 = vld [vmem:[%s36_s11] sm:$0x1] }
  0x15   : > { %56 = vst [vmem:[%s37_s12] sm:$0x1] %v55_v0 }
  0x16   : > { %81 = vsyncadd [#allocation3], 16  ;;  %s34_s7 = sadd.s32 1, %s381_s7  }
  0x17   : > { %p31_p3 = scmp.ge.s32.totalorder %s34_s7, 16  }
  0x18   :  { %s383_s0 = smov (%p31_p3), 0  }
  0x19   :  { %33 = sbr.rel (!%p31_p3) target bundleno = 13 (0xd), region = 153 }
  0x20 LB: > { %375 = dma.done.wait [#allocation3], 16  ;;  %s385_s0 = sphi %s383_s0, %s151_s0  }
  0x21   : > { %376 = vsyncadd [#allocation3], 4294967280  ;;  %s151_s0 = sadd.s32 1, %s385_s0  }
  0x22   : > { %p148_p4 = scmp.ge.s32.totalorder %s151_s0, 16  }
  0x23   :  { %v162_v1 = vld [vmem:[%s472_s3] sm:$0xff] (%p148_p4)  ;;  %v388_v2 = vmov (%p148_p4), 0   ;;  %v163_v3 = vld [vmem:[%s472_s3 + $0x8] sm:$0xff] (%p148_p4)  ;;  %s389_s20 = smov (%p148_p4), [#allocation6]  }
  0x24   :  { %150 = sbr.rel (!%p148_p4) target bundleno = 32 (0x20), region = 175  ;;  %328 = vset.pattern.permute.xlu0 (%p148_p4), %v388_v2  ;;  %v155_v4 = vld [vmem:[%s471_s2] sm:$0xff] (%p148_p4)  ;;  %v159_v7 = vld [vmem:[#allocation2 + $0x8] sm:$0xff] (%p148_p4)  ;;  %s229_s21 = sshll.u32 (%p148_p4), %s389_s20, 4  ;;  %s230_s21 = int_to_ptr.vmem [resolvable:$true] %s229_s21 }
  0x25   :  { %166 = vperm.xlu0 (%p148_p4), %328, %v162_v1   ;;  %v158_v5 = vld [vmem:[#allocation2] sm:$0xff] (%p148_p4)  ;;  %v161_v10 = vadd.f32 (%p148_p4), %v159_v7, %v155_v4  ;;  %s343_s22 = scalar_lea.vmem (%p148_p4), %s230_s21, 256  ;;  %p348_p6 = scmp.lt.s32.totalorder (%p148_p4), %s230_s21, %s230_s21 }
  0x26   :  { %v160_v6 = vadd.f32 (%p148_p4), %v158_v5, %v155_v4  ;;  %v299_v33 = vld [vmem:[%s473_s4] ss:$0 sm:$0xff] (%p148_p4)  ;;  %p344_p5 = scmp.ne.s32.totalorder (%p148_p4), %s230_s21, %s343_s22  ;;  %p349_p7 = scmp.lt.s32.totalorder (%p148_p4), %s343_s22, %s343_s22 }
  0x27   :  { %v300_v35 = vld [vmem:[%s474_s5] ss:$0 sm:$0xff] (%p148_p4) }
  0x28   :  { %p350_p8 = por (%p148_p4), %p349_p7, %p348_p6 }
  0x29   :  { %171 = vperm.xlu0 (%p148_p4), %328, %v163_v3  }
  0x2a   :  { %p351_p9 = pnand (%p148_p4), %p350_p8, %p344_p5 }
  0xa4   :  { %v167_v8 = vpop.permute.xlu0 %166 }
  0xa5   :  { %v174_v9 = vmul.f32 %v167_v8, %v160_v6 }
  0xa7   :  { %176 = vadd.xlane.f32.xlu1 %v174_v9  ;;  %v180_v11 = vmul.f32 %v174_v9, %v174_v9 }
  0xa8   :  { %v172_v12 = vpop.permute.xlu0 %171 }
  0xa9   :  { %v175_v13 = vmul.f32 %v172_v12, %v161_v10  ;;  %182 = vadd.xlane.f32.xlu0 %v180_v11 }
  0xab   :  { %178 = vadd.xlane.f32.xlu1 %v175_v13  ;;  %v181_v14 = vmul.f32 %v175_v13, %v175_v13 }
  0xaf   :  { %184 = vadd.xlane.f32.xlu1 %v181_v14 }
 0x134   :  { %v177_v15 = vpop.xlane.xlu1 %176 }
 0x135   :  { %v186_v16 = vmul.f32 0.03125, %v177_v15 }
 0x136   :  { %v183_v17 = vpop.xlane.xlu0 %182 }
 0x137   :  { %v190_v18 = vmul.f32 %v186_v16, %v186_v16  ;;  %v188_v19 = vmul.f32 0.03125, %v183_v17  ;;  %v200_v31 = vsub.f32 %v174_v9, %v186_v16 }
 0x138   :  { %v179_v20 = vpop.xlane.xlu1 %178 }
 0x139   :  { %v192_v21 = vsub.f32 %v188_v19, %v190_v18  ;;  %v187_v22 = vmul.f32 0.03125, %v179_v20 }
 0x13b   :  { %v194_v23 = vmax.f32 %v192_v21, 0.0  ;;  %v191_v26 = vmul.f32 %v187_v22, %v187_v22  ;;  %v201_v37 = vsub.f32 %v175_v13, %v187_v22 }
 0x13c   :  { %v185_v24 = vpop.xlane.xlu1 %184 }
 0x13d   :  { %v196_v25 = vadd.f32 1e-05, %v194_v23  ;;  %v189_v27 = vmul.f32 0.03125, %v185_v24 }
 0x13f   :  { %329 = vrsqrt.f32 %v196_v25  ;;  %v193_v28 = vsub.f32 %v189_v27, %v191_v26 }
 0x141   :  { %v195_v29 = vmax.f32 %v193_v28, 0.0 }
 0x143   :  { %v197_v30 = vadd.f32 1e-05, %v195_v29 }
 0x145   :  { %331 = vrsqrt.f32 %v197_v30 }
 0x149   :  { %v330_v32 = vpop.eup %329 }
 0x14a   :  { %v202_v34 = vmul.f32 %v330_v32, %v200_v31 }
 0x14c   :  { %v211_v36 = vmul.f32 %v299_v33, %v202_v34 }
 0x14e   :  { %v220_v38 = vadd.f32 %v300_v35, %v211_v36 }
 0x14f   :  { %v332_v39 = vpop.eup %331 }
 0x150   :  { %v203_v40 = vmul.f32 %v332_v39, %v201_v37  ;;  %222 = vst [vmem:[#allocation6] sm:$0xff] %v220_v38 }
 0x152   :  { %v212_v41 = vmul.f32 %v299_v33, %v203_v40 }
 0x154   :  { %v221_v42 = vadd.f32 %v300_v35, %v212_v41 }
 0x156   :  { %223 = vst [vmem:[#allocation6 + $0x8] sm:$0xff] %v221_v42 }
 0x157   :  { %354 = shalt.err (!%p351_p9)
}
 0x158   :  { %s355_s23 = scalar_lea.hbm %s475_s6, 256 }
 0x159   :  { %p356_p10 = scmp.ne.s32.totalorder %s475_s6, %s355_s23  ;;  %p359_p11 = scmp.lt.u32.totalorder %s355_s23, %s475_s6 }
 0x15b   :  { %p361_p12 = pnand %p359_p11, %p356_p10 }
 0x15d   :  { %364 = shalt.err (!%p361_p12)
}
 0x15e   :  { %s390_s28 = smov 128   ;;  %s391_s29 = smov 8  }
 0x15f   :  { %235 = dma.vmem_to_hbm [thread:$0]  %s230_s21, 256, %s475_s6, [#allocation7], %s390_s28, %s390_s28, %s391_s29  }
 0x160   :  { %377 = dma.done.wait [#allocation7], 256  }
 0x161   :  { %378 = vsyncadd [#allocation7], 4294967040 }
 0x162   :  { %239 = vsyncpa [#allocation7], 1 }
 0x163   :  { %240 = vsyncmov [#allocation3] }
 0x166   :  { %s241_s8 = vpop.sfrf %240 }
 0x167   :  { %p301_p13 = scmp.ne.s32.totalorder %s241_s8, 0 }
 0x169   :  { %245 = shalt.err (%p301_p13)  }
 0x16a   :  { %247 = vsyncmov [#allocation3 + $0x1] }
 0x16d   :  { %s248_s9 = vpop.sfrf %247 }
 0x16e   :  { %p302_p0 = scmp.ne.s32.totalorder %s248_s9, 0 }
 0x170   :  { %252 = shalt.err (%p302_p0)  }

</bundles_post_ra>
